<compile_context>
chip_gen: v7x
topology: tpu7x:2x2x1
jax: 0.10.0
libtpu: 0.0.40
codegen_flags: <defaults>
</compile_context>

<pallas_src>
import jax
import jax.numpy as jnp
from jax.experimental import pallas as pl
from jax.experimental.pallas import tpu as pltpu

LANE = 128


def _round_up(x, m):
    return (x + m - 1) // m * m


def _reward_predictor_kernel(x_ref, act_ref,
                             wenc_ref, benc_ref,
                             w1f_ref, w1a_ref, b1_ref,
                             w2_ref, b2_ref,
                             w3r_ref, b3_ref,
                             out_ref):
    bf16 = jnp.bfloat16
    f32 = jnp.float32

    # --- encoder: feat = relu(x @ W_enc + b_enc) ---------------------------------
    # x may arrive f32 (no wrapper copy) or bf16 (padded path); cast is a VPU op
    # hidden under the input DMA.
    x = x_ref[...].astype(bf16)
    feat = jnp.dot(x, wenc_ref[...], preferred_element_type=f32) + benc_ref[...]
    feat = jnp.maximum(feat, 0.0)

    # --- layer 1, fused concat: cat([feat, act]) @ W1 == feat@W1f + act@W1a ------
    act = act_ref[...].astype(bf16)
    h1 = (jnp.dot(feat.astype(bf16), w1f_ref[...], preferred_element_type=f32)
          + jnp.dot(act, w1a_ref[...], preferred_element_type=f32)
          + b1_ref[...])
    h1 = jnp.maximum(h1, 0.0)

    # --- layer 2 ------------------------------------------------------------------
    h2 = jnp.dot(h1.astype(bf16), w2_ref[...], preferred_element_type=f32) + b2_ref[...]
    h2 = jnp.maximum(h2, 0.0)

    # --- layer 3 (N=1): contract hidden against the w3 row so the per-row scalar
    #     lands in the lane axis -> a single lane-dense (1, TB) store per step. ----
    row = jnp.dot(w3r_ref[...], h2.T, preferred_element_type=f32)   # (1, TB)
    out_ref[...] = row + b3_ref[0, 0]


def prepare_params(params):
    """One-time weight packing (hoisted out of the per-call wrapper).

    Weights -> bf16 (halves weight HBM traffic), biases -> f32 rows,
    w3 -> (1, hidden) row, b3 -> (1, 1) SMEM scalar.  No feature-dim padding.
    """
    wenc, benc, w1f, w1a, b1, w2, b2, w3, b3 = params
    bf16, f32 = jnp.bfloat16, jnp.float32
    return dict(
        wenc=jnp.asarray(wenc, bf16),
        benc=jnp.asarray(benc, f32).reshape(1, -1),
        w1f=jnp.asarray(w1f, bf16),
        w1a=jnp.asarray(w1a, bf16),
        b1=jnp.asarray(b1, f32).reshape(1, -1),
        w2=jnp.asarray(w2, bf16),
        b2=jnp.asarray(b2, f32).reshape(1, -1),
        w3r=jnp.asarray(w3, f32).reshape(1, -1),
        b3=jnp.asarray(b3, f32).reshape(1, 1),
    )


def reward_predictor_forward(x, action, prep):
    """x: (B, C, H, W) NCHW, action: (B, action_dim * accumulate_steps) -> (B, 1)."""
    B = x.shape[0]
    in_dim = prep["wenc"].shape[0]
    enc_out = prep["wenc"].shape[1]
    act_dim = prep["w1a"].shape[0]
    hidden = prep["w2"].shape[0]

    x_flat = x.reshape(B, -1)
    assert x_flat.shape[1] == in_dim
    assert action.shape[1] == act_dim

    # Batch tiling: big tiles amortize ~0.35us/step grid overhead; keep >=2 steps
    # for large B so the "parallel" batch axis can shard across v7x's two TCs.
    if B <= LANE:
        TB = _round_up(max(B, 1), 16)          # bf16 packs 16 sublanes per vreg
        B_pad = TB
    else:
        TB = 512
        while TB > LANE and _round_up(B, TB) // TB < 2:
            TB //= 2
        B_pad = _round_up(B, TB)

    bf16 = jnp.bfloat16
    if B_pad == B:
        # Tile-aligned: no wrapper-side copy at all; in-kernel bf16 cast.
        x_in, act_in = x_flat, action
    else:
        # Pad copy is unavoidable -> emit bf16 so the kernel re-reads half the bytes.
        x_in = jnp.zeros((B_pad, in_dim), bf16).at[:B].set(x_flat.astype(bf16))
        act_in = jnp.zeros((B_pad, act_dim), bf16).at[:B].set(action.astype(bf16))

    grid = (B_pad // TB,)

    in_specs = [
        pl.BlockSpec((TB, in_dim), lambda i: (i, 0)),        # x tile (pipelined)
        pl.BlockSpec((TB, act_dim), lambda i: (i, 0)),        # action tile (pipelined)
        pl.BlockSpec((in_dim, enc_out), lambda i: (0, 0)),    # wenc (VMEM resident)
        pl.BlockSpec((1, enc_out), lambda i: (0, 0)),         # benc
        pl.BlockSpec((enc_out, hidden), lambda i: (0, 0)),    # w1f
        pl.BlockSpec((act_dim, hidden), lambda i: (0, 0)),    # w1a
        pl.BlockSpec((1, hidden), lambda i: (0, 0)),          # b1
        pl.BlockSpec((hidden, hidden), lambda i: (0, 0)),     # w2
        pl.BlockSpec((1, hidden), lambda i: (0, 0)),          # b2
        pl.BlockSpec((1, hidden), lambda i: (0, 0)),          # w3 row
        pl.BlockSpec(memory_space=pltpu.MemorySpace.SMEM),    # b3 scalar
    ]
    # Lane-packed output: one (1, TB) f32 row per grid step (no 128-wide slab).
    out_spec = pl.BlockSpec((1, TB), lambda i: (0, i))
    out_shape = jax.ShapeDtypeStruct((1, B_pad), jnp.float32)

    flops = 2 * B_pad * (in_dim * enc_out + enc_out * hidden + act_dim * hidden
                         + hidden * hidden + hidden)
    bytes_accessed = (
        x_in.size * x_in.dtype.itemsize
        + act_in.size * act_in.dtype.itemsize
        + 2 * (prep["wenc"].size + prep["w1f"].size + prep["w1a"].size + prep["w2"].size)
        + 4 * (prep["benc"].size + prep["b1"].size + prep["b2"].size
               + prep["w3r"].size + prep["b3"].size)
        + 4 * B_pad)
    cost = pl.CostEstimate(flops=flops, transcendentals=0,
                           bytes_accessed=bytes_accessed)

    out_row = pl.pallas_call(
        _reward_predictor_kernel,
        out_shape=out_shape,
        grid=grid,
        in_specs=in_specs,
        out_specs=out_spec,
        compiler_params=pltpu.CompilerParams(
            dimension_semantics=("parallel",)),
        cost_estimate=cost,
    )(x_in, act_in, prep["wenc"], prep["benc"], prep["w1f"], prep["w1a"],
      prep["b1"], prep["w2"], prep["b2"], prep["w3r"], prep["b3"])

    return out_row[0, :B].reshape(B, 1)


def init_params(key, in_dim, enc_out_dim, action_dim, hidden_dim):
    """Deterministic synthetic init (stands in for weight_init/orthogonal)."""
    ks = jax.random.split(key, 10)
    scale = 0.05
    wenc = scale * jax.random.normal(ks[0], (in_dim, enc_out_dim), jnp.float32)
    benc = 0.01 * jax.random.normal(ks[1], (1, enc_out_dim), jnp.float32)
    # first MLP linear: input = [enc_out_dim | action_dim], split for fused concat
    w1f = scale * jax.random.normal(ks[2], (enc_out_dim, hidden_dim), jnp.float32)
    w1a = scale * jax.random.normal(ks[3], (action_dim, hidden_dim), jnp.float32)
    b1 = 0.01 * jax.random.normal(ks[4], (1, hidden_dim), jnp.float32)
    w2 = scale * jax.random.normal(ks[5], (hidden_dim, hidden_dim), jnp.float32)
    b2 = 0.01 * jax.random.normal(ks[6], (1, hidden_dim), jnp.float32)
    w3 = scale * jax.random.normal(ks[7], (hidden_dim, 1), jnp.float32)
    b3 = 0.01 * jax.random.normal(ks[8], (1, 1), jnp.float32)
    return (wenc, benc, w1f, w1a, b1, w2, b2, w3, b3)


def reference_forward(x, action, params):
    """Pure-JAX reference with the same bf16-weight / f32-accumulate precision."""
    (wenc, benc, w1f, w1a, b1, w2, b2, w3, b3) = params
    bf16, f32 = jnp.bfloat16, jnp.float32
    B = x.shape[0]
    xf = x.reshape(B, -1).astype(bf16)
    feat = jnp.maximum(
        jnp.dot(xf, wenc.astype(bf16), preferred_element_type=f32)
        + benc.reshape(1, -1), 0.0)
    h1 = jnp.maximum(
        jnp.dot(feat.astype(bf16), w1f.astype(bf16), preferred_element_type=f32)
        + jnp.dot(action.astype(bf16), w1a.astype(bf16), preferred_element_type=f32)
        + b1.reshape(1, -1), 0.0)
    h2 = jnp.maximum(
        jnp.dot(h1.astype(bf16), w2.astype(bf16), preferred_element_type=f32)
        + b2.reshape(1, -1), 0.0)
    return jnp.dot(h2, w3.reshape(-1, 1)) + b3.reshape(1, 1)


if __name__ == "__main__":
    # small shapes consistent with the module
    B, C, Himg, Wimg = 8, 4, 16, 16        # image observation (NCHW)
    action_dim, accumulate_steps = 4, 2    # action_shape=(4,), accumulate_steps=2
    enc_out_dim = 32                       # encoder.out_dim
    hidden_dim = 32

    key = jax.random.PRNGKey(0)
    kx, ka, kp = jax.random.split(key, 3)

    x = jax.random.normal(kx, (B, C, Himg, Wimg), jnp.float32)
    action = jax.random.normal(ka, (B, action_dim * accumulate_steps), jnp.float32)

    params = init_params(kp, C * Himg * Wimg, enc_out_dim,
                         action_dim * accumulate_steps, hidden_dim)
    prep = prepare_params(params)          # one-time weight packing (not per call)

    out = reward_predictor_forward(x, action, prep)
    out = jax.block_until_ready(out)

    ref = reference_forward(x, action, params)
    assert out.shape == (B, 1), out.shape
    assert jnp.allclose(out, ref, atol=1e-2, rtol=1e-2), "mismatch vs reference"

    print("KERNEL_OK")
</pallas_src>

<mosaic_0001>
module attributes {stable_mosaic.version = 11 : i64} {
  func.func @_reward_predictor_kernel(%arg0: i32, %arg1: memref<16x1024xbf16, #tpu.memory_space<vmem>>, %arg2: memref<16x8xbf16, #tpu.memory_space<vmem>>, %arg3: memref<1024x32xbf16, #tpu.memory_space<vmem>>, %arg4: memref<1x32xf32, #tpu.memory_space<vmem>>, %arg5: memref<32x32xbf16, #tpu.memory_space<vmem>>, %arg6: memref<8x32xbf16, #tpu.memory_space<vmem>>, %arg7: memref<1x32xf32, #tpu.memory_space<vmem>>, %arg8: memref<32x32xbf16, #tpu.memory_space<vmem>>, %arg9: memref<1x32xf32, #tpu.memory_space<vmem>>, %arg10: memref<1x32xf32, #tpu.memory_space<vmem>>, %arg11: memref<1x1xf32, #tpu.memory_space<smem>>, %arg12: memref<1x16xf32, #tpu.memory_space<vmem>>) attributes {dimension_semantics = [#tpu.dimension_semantics<parallel>], iteration_bounds = array<i64: 1>, scalar_prefetch = 0 : i64, scratch_operands = 0 : i64, tpu.core_type = #tpu.core_type<tc>, window_params = [{transform_indices = @transform_0, window_bounds = array<i64: 16, 1024>}, {transform_indices = @transform_1, window_bounds = array<i64: 16, 8>}, {pipeline_mode = #tpu.pipeline_mode<synchronous>, transform_indices = @transform_2, window_bounds = array<i64: 1024, 32>}, {pipeline_mode = #tpu.pipeline_mode<synchronous>, transform_indices = @transform_3, window_bounds = array<i64: 1, 32>}, {pipeline_mode = #tpu.pipeline_mode<synchronous>, transform_indices = @transform_4, window_bounds = array<i64: 32, 32>}, {pipeline_mode = #tpu.pipeline_mode<synchronous>, transform_indices = @transform_5, window_bounds = array<i64: 8, 32>}, {pipeline_mode = #tpu.pipeline_mode<synchronous>, transform_indices = @transform_6, window_bounds = array<i64: 1, 32>}, {pipeline_mode = #tpu.pipeline_mode<synchronous>, transform_indices = @transform_7, window_bounds = array<i64: 32, 32>}, {pipeline_mode = #tpu.pipeline_mode<synchronous>, transform_indices = @transform_8, window_bounds = array<i64: 1, 32>}, {pipeline_mode = #tpu.pipeline_mode<synchronous>, transform_indices = @transform_9, window_bounds = array<i64: 1, 32>}, {transform_indices = @transform_10, window_bounds = array<i64: 1, 1>}, {transform_indices = @transform_11, window_bounds = array<i64: 1, 16>}]} {
    %c0 = arith.constant 0 : index
    %c0_0 = arith.constant 0 : index
    %0 = vector.load %arg1[%c0, %c0_0] : memref<16x1024xbf16, #tpu.memory_space<vmem>>, vector<16x1024xbf16>
    %c0_1 = arith.constant 0 : index
    %c0_2 = arith.constant 0 : index
    %1 = vector.load %arg3[%c0_1, %c0_2] : memref<1024x32xbf16, #tpu.memory_space<vmem>>, vector<1024x32xbf16>
    %cst = arith.constant dense<0.000000e+00> : vector<16x32xf32>
    %2 = tpu.matmul %0, %1, %cst {dimension_numbers = #tpu.dot_dimension_numbers<[1], [0], [0], [1], [0, 0, 1, 1], [], []>} : vector<16x1024xbf16>, vector<1024x32xbf16>, vector<16x32xf32> -> vector<16x32xf32>
    %c0_3 = arith.constant 0 : index
    %c0_4 = arith.constant 0 : index
    %3 = vector.load %arg4[%c0_3, %c0_4] : memref<1x32xf32, #tpu.memory_space<vmem>>, vector<1x32xf32>
    %4 = vector.broadcast %3 : vector<1x32xf32> to vector<16x32xf32>
    %5 = arith.addf %2, %4 : vector<16x32xf32>
    %cst_5 = arith.constant 0.000000e+00 : f32
    %6 = vector.broadcast %cst_5 : f32 to vector<16x32xf32>
    %7 = arith.maximumf %5, %6 : vector<16x32xf32>
    %c0_6 = arith.constant 0 : index
    %c0_7 = arith.constant 0 : index
    %8 = vector.load %arg2[%c0_6, %c0_7] : memref<16x8xbf16, #tpu.memory_space<vmem>>, vector<16x8xbf16>
    %9 = arith.truncf %7 : vector<16x32xf32> to vector<16x32xbf16>
    %c0_8 = arith.constant 0 : index
    %c0_9 = arith.constant 0 : index
    %10 = vector.load %arg5[%c0_8, %c0_9] : memref<32x32xbf16, #tpu.memory_space<vmem>>, vector<32x32xbf16>
    %cst_10 = arith.constant dense<0.000000e+00> : vector<16x32xf32>
    %11 = tpu.matmul %9, %10, %cst_10 {dimension_numbers = #tpu.dot_dimension_numbers<[1], [0], [0], [1], [0, 0, 1, 1], [], []>} : vector<16x32xbf16>, vector<32x32xbf16>, vector<16x32xf32> -> vector<16x32xf32>
    %c0_11 = arith.constant 0 : index
    %c0_12 = arith.constant 0 : index
    %12 = vector.load %arg6[%c0_11, %c0_12] : memref<8x32xbf16, #tpu.memory_space<vmem>>, vector<8x32xbf16>
    %cst_13 = arith.constant dense<0.000000e+00> : vector<16x32xf32>
    %13 = tpu.matmul %8, %12, %cst_13 {dimension_numbers = #tpu.dot_dimension_numbers<[1], [0], [0], [1], [0, 0, 1, 1], [], []>} : vector<16x8xbf16>, vector<8x32xbf16>, vector<16x32xf32> -> vector<16x32xf32>
    %14 = arith.addf %11, %13 : vector<16x32xf32>
    %c0_14 = arith.constant 0 : index
    %c0_15 = arith.constant 0 : index
    %15 = vector.load %arg7[%c0_14, %c0_15] : memref<1x32xf32, #tpu.memory_space<vmem>>, vector<1x32xf32>
    %16 = vector.broadcast %15 : vector<1x32xf32> to vector<16x32xf32>
    %17 = arith.addf %14, %16 : vector<16x32xf32>
    %cst_16 = arith.constant 0.000000e+00 : f32
    %18 = vector.broadcast %cst_16 : f32 to vector<16x32xf32>
    %19 = arith.maximumf %17, %18 : vector<16x32xf32>
    %20 = arith.truncf %19 : vector<16x32xf32> to vector<16x32xbf16>
    %c0_17 = arith.constant 0 : index
    %c0_18 = arith.constant 0 : index
    %21 = vector.load %arg8[%c0_17, %c0_18] : memref<32x32xbf16, #tpu.memory_space<vmem>>, vector<32x32xbf16>
    %cst_19 = arith.constant dense<0.000000e+00> : vector<16x32xf32>
    %22 = tpu.matmul %20, %21, %cst_19 {dimension_numbers = #tpu.dot_dimension_numbers<[1], [0], [0], [1], [0, 0, 1, 1], [], []>} : vector<16x32xbf16>, vector<32x32xbf16>, vector<16x32xf32> -> vector<16x32xf32>
    %c0_20 = arith.constant 0 : index
    %c0_21 = arith.constant 0 : index
    %23 = vector.load %arg9[%c0_20, %c0_21] : memref<1x32xf32, #tpu.memory_space<vmem>>, vector<1x32xf32>
    %24 = vector.broadcast %23 : vector<1x32xf32> to vector<16x32xf32>
    %25 = arith.addf %22, %24 : vector<16x32xf32>
    %cst_22 = arith.constant 0.000000e+00 : f32
    %26 = vector.broadcast %cst_22 : f32 to vector<16x32xf32>
    %27 = arith.maximumf %25, %26 : vector<16x32xf32>
    %c0_23 = arith.constant 0 : index
    %c0_24 = arith.constant 0 : index
    %28 = vector.load %arg10[%c0_23, %c0_24] : memref<1x32xf32, #tpu.memory_space<vmem>>, vector<1x32xf32>
    %29 = tpu.transpose %27, [1, 0] : vector<16x32xf32> -> vector<32x16xf32>
    %cst_25 = arith.constant dense<0.000000e+00> : vector<1x16xf32>
    %30 = tpu.matmul %28, %29, %cst_25 {dimension_numbers = #tpu.dot_dimension_numbers<[1], [0], [0], [1], [0, 0, 1, 1], [], []>} : vector<1x32xf32>, vector<32x16xf32>, vector<1x16xf32> -> vector<1x16xf32>
    %c0_26 = arith.constant 0 : index
    %c0_27 = arith.constant 0 : index
    %31 = memref.load %arg11[%c0_26, %c0_27] : memref<1x1xf32, #tpu.memory_space<smem>>
    %32 = vector.broadcast %31 : f32 to vector<1x16xf32>
    %33 = arith.addf %30, %32 : vector<1x16xf32>
    %c0_28 = arith.constant 0 : index
    %c0_29 = arith.constant 0 : index
    %34 = vector.load %arg12[%c0_28, %c0_29] : memref<1x16xf32, #tpu.memory_space<vmem>>, vector<1x16xf32>
    tpu.vector_store %arg12[%c0_28, %c0_29], %33 {strides = array<i32>} : memref<1x16xf32, #tpu.memory_space<vmem>>, vector<1x16xf32>,
    return
  }
  func.func @transform_0(%arg0: i32) -> (i32, i32) {
    %c0_i32 = arith.constant 0 : i32
    %c0_i32_0 = arith.constant 0 : i32
    return %arg0, %c0_i32 : i32, i32
  }
  func.func @transform_1(%arg0: i32) -> (i32, i32) {
    %c0_i32 = arith.constant 0 : i32
    %c0_i32_0 = arith.constant 0 : i32
    return %arg0, %c0_i32 : i32, i32
  }
  func.func @transform_2(%arg0: i32) -> (i32, i32) {
    %c0_i32 = arith.constant 0 : i32
    %c0_i32_0 = arith.constant 0 : i32
    %c0_i32_1 = arith.constant 0 : i32
    return %c0_i32, %c0_i32_0 : i32, i32
  }
  func.func @transform_3(%arg0: i32) -> (i32, i32) {
    %c0_i32 = arith.constant 0 : i32
    %c0_i32_0 = arith.constant 0 : i32
    %c0_i32_1 = arith.constant 0 : i32
    return %c0_i32, %c0_i32_0 : i32, i32
  }
  func.func @transform_4(%arg0: i32) -> (i32, i32) {
    %c0_i32 = arith.constant 0 : i32
    %c0_i32_0 = arith.constant 0 : i32
    %c0_i32_1 = arith.constant 0 : i32
    return %c0_i32, %c0_i32_0 : i32, i32
  }
  func.func @transform_5(%arg0: i32) -> (i32, i32) {
    %c0_i32 = arith.constant 0 : i32
    %c0_i32_0 = arith.constant 0 : i32
    %c0_i32_1 = arith.constant 0 : i32
    return %c0_i32, %c0_i32_0 : i32, i32
  }
  func.func @transform_6(%arg0: i32) -> (i32, i32) {
    %c0_i32 = arith.constant 0 : i32
    %c0_i32_0 = arith.constant 0 : i32
    %c0_i32_1 = arith.constant 0 : i32
    return %c0_i32, %c0_i32_0 : i32, i32
  }
  func.func @transform_7(%arg0: i32) -> (i32, i32) {
    %c0_i32 = arith.constant 0 : i32
    %c0_i32_0 = arith.constant 0 : i32
    %c0_i32_1 = arith.constant 0 : i32
    return %c0_i32, %c0_i32_0 : i32, i32
  }
  func.func @transform_8(%arg0: i32) -> (i32, i32) {
    %c0_i32 = arith.constant 0 : i32
    %c0_i32_0 = arith.constant 0 : i32
    %c0_i32_1 = arith.constant 0 : i32
    return %c0_i32, %c0_i32_0 : i32, i32
  }
  func.func @transform_9(%arg0: i32) -> (i32, i32) {
    %c0_i32 = arith.constant 0 : i32
    %c0_i32_0 = arith.constant 0 : i32
    %c0_i32_1 = arith.constant 0 : i32
    return %c0_i32, %c0_i32_0 : i32, i32
  }
  func.func @transform_10(%arg0: i32) -> (i32, i32) {
    %c0_i32 = arith.constant 0 : i32
    %c0_i32_0 = arith.constant 0 : i32
    %c0_i32_1 = arith.constant 0 : i32
    return %c0_i32, %c0_i32_0 : i32, i32
  }
  func.func @transform_11(%arg0: i32) -> (i32, i32) {
    %c0_i32 = arith.constant 0 : i32
    %c0_i32_0 = arith.constant 0 : i32
    return %c0_i32, %arg0 : i32, i32
  }
}

</mosaic_0001>

<bundles_post_ra>
// kernel: tpu_custom_call.1
= control target key start
LH: loop header
LB: loop body
LE: loop exit
PB: predicated region body
PF: predicated region fallthrough
CT: control target
= control target key end

     0   :  { %s1730_s0 = inlined_call_operand.vmem [shape: bf16[16,1024], index: 0, kind: input, shape index: {}]   ;;  %s1731_s1 = inlined_call_operand.vmem [shape: bf16[16,8], index: 1, kind: input, shape index: {}]   ;;  %s1732_s2 = inlined_call_operand.vmem [shape: bf16[1024,32], index: 2, kind: input, shape index: {}]   ;;  %s1733_s3 = inlined_call_operand.vmem [shape: f32[1,32], index: 3, kind: input, shape index: {}]   ;;  %s1734_s4 = inlined_call_operand.vmem [shape: bf16[32,32], index: 4, kind: input, shape index: {}]   ;;  %s1735_s5 = inlined_call_operand.vmem [shape: bf16[8,32], index: 5, kind: input, shape index: {}]   ;;  %s1736_s6 = inlined_call_operand.vmem [shape: f32[1,32], index: 6, kind: input, shape index: {}]   ;;  %s1737_s7 = inlined_call_operand.vmem [shape: bf16[32,32], index: 7, kind: input, shape index: {}]   ;;  %s1738_s8 = inlined_call_operand.vmem [shape: f32[1,32], index: 8, kind: input, shape index: {}]   ;;  %s1739_s9 = inlined_call_operand.vmem [shape: f32[1,32], index: 9, kind: input, shape index: {}]   ;;  %s1740_s10 = inlined_call_operand.<no memory space> [shape: f32[1,1], index: 10, kind: input, shape index: {}]   ;;  %s1741_s11 = inlined_call_operand.hbm [shape: f32[1,16], index: 11, kind: output, shape index: {}]  }
   0x1   :  { %v1294_v0 = vld [vmem:[%s1732_s2 + $0x40] sm:$0xff]   ;;  %v1298_v4 = vld [vmem:[%s1732_s2 + $0x48] sm:$0xff]   ;;  %v1302_v8 = vld [vmem:[%s1732_s2 + $0x50] sm:$0xff]  }
   0x2   :  { %v1295_v1 = vld [vmem:[%s1732_s2 + $0xc0] sm:$0xff]   ;;  %1158 = vmatprep.subr.bf16.mxu0 %v1294_v0  ;;  %v1299_v5 = vld [vmem:[%s1732_s2 + $0xc8] sm:$0xff]   ;;  %v1303_v9 = vld [vmem:[%s1732_s2 + $0xd0] sm:$0xff]  }
   0x3   :  { %v1296_v2 = vld [vmem:[%s1732_s2] sm:$0xff]   ;;  %1180 = vmatprep.subr.bf16.mxu1 %v1295_v1  ;;  %v1300_v6 = vld [vmem:[%s1732_s2 + $0x8] sm:$0xff]   ;;  %v1304_v10 = vld [vmem:[%s1732_s2 + $0x10] sm:$0xff]  }
   0x4   :  { %v1297_v3 = vld [vmem:[%s1732_s2 + $0x80] sm:$0xff]   ;;  %1159 = vmatpush3.bf16.msra.mxu0 %v1296_v2  ;;  %v1301_v7 = vld [vmem:[%s1732_s2 + $0x88] sm:$0xff]   ;;  %v1305_v11 = vld [vmem:[%s1732_s2 + $0x90] sm:$0xff]  }
   0x5   :  { %1181 = vmatpush3.bf16.msra.mxu1 %v1297_v3  ;;  %1160 = vmatprep.subr.bf16.mxu0 %v1298_v4  ;;  %v1306_v12 = vld [vmem:[%s1732_s2 + $0x58] sm:$0xff]   ;;  %v1310_v16 = vld [vmem:[%s1732_s2 + $0x60] sm:$0xff]   ;;  %v1314_v20 = vld [vmem:[%s1732_s2 + $0x68] sm:$0xff]  }
   0x6   :  { %1182 = vmatprep.subr.bf16.mxu1 %v1299_v5  ;;  %v1307_v13 = vld [vmem:[%s1732_s2 + $0xd8] sm:$0xff]   ;;  %v1311_v17 = vld [vmem:[%s1732_s2 + $0xe0] sm:$0xff]   ;;  %v1315_v21 = vld [vmem:[%s1732_s2 + $0xe8] sm:$0xff]  }
   0x7   :  { %v1308_v14 = vld [vmem:[%s1732_s2 + $0x18] sm:$0xff]   ;;  %v1312_v18 = vld [vmem:[%s1732_s2 + $0x20] sm:$0xff]   ;;  %v1316_v22 = vld [vmem:[%s1732_s2 + $0x28] sm:$0xff]  }
   0x8   :  { %1161 = vmatpush3.bf16.msra.mxu0 %v1300_v6  ;;  %v1309_v15 = vld [vmem:[%s1732_s2 + $0x98] sm:$0xff]   ;;  %v1313_v19 = vld [vmem:[%s1732_s2 + $0xa0] sm:$0xff]   ;;  %v1317_v23 = vld [vmem:[%s1732_s2 + $0xa8] sm:$0xff]  }
   0x9   :  { %1183 = vmatpush3.bf16.msra.mxu1 %v1301_v7  ;;  %1162 = vmatprep.subr.bf16.mxu0 %v1302_v8  ;;  %v1318_v24 = vld [vmem:[%s1732_s2 + $0x70] sm:$0xff]   ;;  %v1322_v28 = vld [vmem:[%s1732_s2 + $0x78] sm:$0xff]   ;;  %v41_v32 = vld [vmem:[%s1730_s0] sm:$0xff] }
   0xa   :  { %1184 = vmatprep.subr.bf16.mxu1 %v1303_v9  ;;  %v1319_v25 = vld [vmem:[%s1732_s2 + $0xf0] sm:$0xff]   ;;  %v1323_v29 = vld [vmem:[%s1732_s2 + $0xf8] sm:$0xff]   ;;  %v45_v33 = vld [vmem:[%s1730_s0 + $0x20] sm:$0xff] }
   0xb   :  { %v1320_v26 = vld [vmem:[%s1732_s2 + $0x30] sm:$0xff]   ;;  %v1324_v30 = vld [vmem:[%s1732_s2 + $0x38] sm:$0xff]   ;;  %v42_v34 = vld [vmem:[%s1730_s0 + $0x8] sm:$0xff]  ;;  %v1073_v35 = vcombine.low %v41_v32, %v45_v33  ;;  %v1074_v36 = vcombine.high %v41_v32, %v45_v33 }
   0xc   :  { %1163 = vmatpush3.bf16.msra.mxu0 %v1304_v10  ;;  %v1321_v27 = vld [vmem:[%s1732_s2 + $0xb0] sm:$0xff]   ;;  %v1325_v31 = vld [vmem:[%s1732_s2 + $0xb8] sm:$0xff]   ;;  %v46_v37 = vld [vmem:[%s1730_s0 + $0x28] sm:$0xff] }
   0xd   :  { %1185 = vmatpush3.bf16.msra.mxu1 %v1305_v11  ;;  %1164 = vmatprep.subr.bf16.mxu0 %v1306_v12  ;;  %v1075_v38 = vcombine.low %v42_v34, %v46_v37  ;;  %v1076_v39 = vcombine.high %v42_v34, %v46_v37  ;;  %v1326_v40 = vld [vmem:[%s1732_s2 + $0x140] sm:$0xff]   ;;  %v1330_v44 = vld [vmem:[%s1732_s2 + $0x148] sm:$0xff]   ;;  %v1334_v48 = vld [vmem:[%s1732_s2 + $0x150] sm:$0xff]  }
   0xe   :  { %1186 = vmatprep.subr.bf16.mxu1 %v1307_v13  ;;  %640 = vmatprep.mubr.bf16.mxu0 %v1074_v36  ;;  %v1327_v41 = vld [vmem:[%s1732_s2 + $0x1c0] sm:$0xff]   ;;  %v1331_v45 = vld [vmem:[%s1732_s2 + $0x1c8] sm:$0xff]   ;;  %v1335_v49 = vld [vmem:[%s1732_s2 + $0x1d0] sm:$0xff]  }
   0xf   :  { %681 = vmatprep.mubr.bf16.mxu1 %v1076_v39  ;;  %v1328_v42 = vld [vmem:[%s1732_s2 + $0x100] sm:$0xff]   ;;  %v1332_v46 = vld [vmem:[%s1732_s2 + $0x108] sm:$0xff]   ;;  %v1336_v50 = vld [vmem:[%s1732_s2 + $0x110] sm:$0xff]  }
  0x10   :  { %1165 = vmatpush3.bf16.msra.mxu0 %v1308_v14  ;;  %v1329_v43 = vld [vmem:[%s1732_s2 + $0x180] sm:$0xff]   ;;  %v1333_v47 = vld [vmem:[%s1732_s2 + $0x188] sm:$0xff]   ;;  %v1337_v51 = vld [vmem:[%s1732_s2 + $0x190] sm:$0xff]  }
  0x11   :  { %1187 = vmatpush3.bf16.msra.mxu1 %v1309_v15  ;;  %1166 = vmatprep.subr.bf16.mxu0 %v1310_v16  ;;  %v1338_v52 = vld [vmem:[%s1732_s2 + $0x158] sm:$0xff]   ;;  %v1342_v56 = vld [vmem:[%s1732_s2 + $0x160] sm:$0xff]   ;;  %v1346_v60 = vld [vmem:[%s1732_s2 + $0x168] sm:$0xff]  }
  0x12   :  { %1188 = vmatprep.subr.bf16.mxu1 %v1311_v17  ;;  %v1339_v53 = vld [vmem:[%s1732_s2 + $0x1d8] sm:$0xff]   ;;  %v1343_v57 = vld [vmem:[%s1732_s2 + $0x1e0] sm:$0xff]   ;;  %v1347_v61 = vld [vmem:[%s1732_s2 + $0x1e8] sm:$0xff]  }
  0x13   :  { %v1340_v54 = vld [vmem:[%s1732_s2 + $0x118] sm:$0xff]   ;;  %v1344_v58 = vld [vmem:[%s1732_s2 + $0x120] sm:$0xff]   ;;  %v1348_v62 = vld [vmem:[%s1732_s2 + $0x128] sm:$0xff]  }
  0x14   :  { %1167 = vmatpush3.bf16.msra.mxu0 %v1312_v18  ;;  %v1341_v55 = vld [vmem:[%s1732_s2 + $0x198] sm:$0xff]   ;;  %v1345_v59 = vld [vmem:[%s1732_s2 + $0x1a0] sm:$0xff]   ;;  %v1349_v63 = vld [vmem:[%s1732_s2 + $0x1a8] sm:$0xff]  }
  0x15   :  { %1189 = vmatpush3.bf16.msra.mxu1 %v1313_v19  ;;  %1168 = vmatprep.subr.bf16.mxu0 %v1314_v20  ;;  %v1350_v0 = vld [vmem:[%s1732_s2 + $0x170] sm:$0xff]   ;;  %v1354_v4 = vld [vmem:[%s1732_s2 + $0x178] sm:$0xff]  }
  0x16   :  { %1190 = vmatprep.subr.bf16.mxu1 %v1315_v21  ;;  %v1351_v1 = vld [vmem:[%s1732_s2 + $0x1f0] sm:$0xff]   ;;  %v1355_v5 = vld [vmem:[%s1732_s2 + $0x1f8] sm:$0xff]  }
  0x17   :  { %v1352_v2 = vld [vmem:[%s1732_s2 + $0x130] sm:$0xff]   ;;  %v1356_v6 = vld [vmem:[%s1732_s2 + $0x138] sm:$0xff]  }
  0x18   :  { %1169 = vmatpush3.bf16.msra.mxu0 %v1316_v22  ;;  %v1353_v3 = vld [vmem:[%s1732_s2 + $0x1b0] sm:$0xff]   ;;  %v1357_v7 = vld [vmem:[%s1732_s2 + $0x1b8] sm:$0xff]  }
  0x19   :  { %1191 = vmatpush3.bf16.msra.mxu1 %v1317_v23  ;;  %1170 = vmatprep.subr.bf16.mxu0 %v1318_v24  ;;  %v43_v8 = vld [vmem:[%s1730_s0 + $0x10] sm:$0xff]  ;;  %v44_v12 = vld [vmem:[%s1730_s0 + $0x18] sm:$0xff] }
  0x1a   :  { %1192 = vmatprep.subr.bf16.mxu1 %v1319_v25  ;;  %v47_v9 = vld [vmem:[%s1730_s0 + $0x30] sm:$0xff]  ;;  %v48_v13 = vld [vmem:[%s1730_s0 + $0x38] sm:$0xff] }
  0x1b   :  { %v1077_v10 = vcombine.low %v43_v8, %v47_v9  ;;  %v1078_v11 = vcombine.high %v43_v8, %v47_v9  ;;  %v1079_v14 = vcombine.low %v44_v12, %v48_v13  ;;  %v1080_v15 = vcombine.high %v44_v12, %v48_v13 }
  0x1c   :  { %1171 = vmatpush3.bf16.msra.mxu0 %v1320_v26 }
  0x1d   :  { %1193 = vmatpush3.bf16.msra.mxu1 %v1321_v27  ;;  %1172 = vmatprep.subr.bf16.mxu0 %v1322_v28 }
  0x1e   :  { %1194 = vmatprep.subr.bf16.mxu1 %v1323_v29 }
  0x20   :  { %1173 = vmatpush3.bf16.msra.mxu0 %v1324_v30 }
  0x21   :  { %1195 = vmatpush3.bf16.msra.mxu1 %v1325_v31  ;;  %1202 = vmatprep.subr.bf16.mxu0 %v1326_v40 }
  0x22   :  { %1224 = vmatprep.subr.bf16.mxu1 %v1327_v41 }
  0x23   :  { %641 = vmatmul.mubr.bf16.vlgmr.msra.gmra.mrb[0].mxu0 %v1073_v35 }
  0x24   :  { %682 = vmatmul.mubr.bf16.vlgmr.msra.gmra.mrb[0].mxu1 %v1075_v38  ;;  %1203 = vmatpush3.bf16.msra.mxu0 %v1328_v42 }
  0x25   :  { %1225 = vmatpush3.bf16.msra.mxu1 %v1329_v43  ;;  %1204 = vmatprep.subr.bf16.mxu0 %v1330_v44 }
  0x26   :  { %1226 = vmatprep.subr.bf16.mxu1 %v1331_v45  ;;  %722 = vmatprep.mubr.bf16.mxu0 %v1078_v11 }
  0x27   :  { %763 = vmatprep.mubr.bf16.mxu1 %v1080_v15 }
  0x28   :  { %1205 = vmatpush3.bf16.msra.mxu0 %v1332_v46 }
  0x29   :  { %1227 = vmatpush3.bf16.msra.mxu1 %v1333_v47  ;;  %1206 = vmatprep.subr.bf16.mxu0 %v1334_v48 }
  0x2a   :  { %1228 = vmatprep.subr.bf16.mxu1 %v1335_v49 }
  0x2c   :  { %1207 = vmatpush3.bf16.msra.mxu0 %v1336_v50 }
  0x2d   :  { %1229 = vmatpush3.bf16.msra.mxu1 %v1337_v51  ;;  %1208 = vmatprep.subr.bf16.mxu0 %v1338_v52 }
  0x2e   :  { %1230 = vmatprep.subr.bf16.mxu1 %v1339_v53 }
  0x30   :  { %1209 = vmatpush3.bf16.msra.mxu0 %v1340_v54 }
  0x31   :  { %1231 = vmatpush3.bf16.msra.mxu1 %v1341_v55  ;;  %1210 = vmatprep.subr.bf16.mxu0 %v1342_v56 }
  0x32   :  { %1232 = vmatprep.subr.bf16.mxu1 %v1343_v57 }
  0x34   :  { %1211 = vmatpush3.bf16.msra.mxu0 %v1344_v58 }
  0x35   :  { %1233 = vmatpush3.bf16.msra.mxu1 %v1345_v59  ;;  %1212 = vmatprep.subr.bf16.mxu0 %v1346_v60 }
  0x36   :  { %1234 = vmatprep.subr.bf16.mxu1 %v1347_v61 }
  0x38   :  { %1213 = vmatpush3.bf16.msra.mxu0 %v1348_v62 }
  0x39   :  { %1235 = vmatpush3.bf16.msra.mxu1 %v1349_v63  ;;  %1214 = vmatprep.subr.bf16.mxu0 %v1350_v0 }
  0x3a   :  { %1236 = vmatprep.subr.bf16.mxu1 %v1351_v1 }
  0x3c   :  { %1215 = vmatpush3.bf16.msra.mxu0 %v1352_v2 }
  0x3d   :  { %1237 = vmatpush3.bf16.msra.mxu1 %v1353_v3  ;;  %1216 = vmatprep.subr.bf16.mxu0 %v1354_v4 }
  0x3e   :  { %1238 = vmatprep.subr.bf16.mxu1 %v1355_v5 }
  0x40   :  { %1217 = vmatpush3.bf16.msra.mxu0 %v1356_v6 }
  0x41   :  { %1239 = vmatpush3.bf16.msra.mxu1 %v1357_v7 }
  0x43   :  { %723 = vmatmul.mubr.bf16.vlgmr.msra.gmra.mrb[4].mxu0 %v1077_v10 }
  0x44   :  { %764 = vmatmul.mubr.bf16.vlgmr.msra.gmra.mrb[4].mxu1 %v1079_v14 }
  0x45   :  { %17 = vsyncpa [#allocation4], 0  ;;  %v1358_v16 = vld [vmem:[%s1734_s4] sm:$0xff]   ;;  %v1387_v17 = vmov 0.0   ;;  %vm791_vm0 = vcmask 1043456   ;;  %v1360_v21 = vld [vmem:[%s1734_s4 + $0x8] sm:$0xff]  }
  0x46   :  { %1257 = vmatprep.subr.bf16.mxu0 %v1387_v17  ;;  %1263 = vmatprep.subr.bf16.mxu1 %v1387_v17  ;;  %v781_v18 = vld [vmem:[%s1735_s5] sm:$0xf]  ;;  %vm1388_vm1 = vmmov 0   ;;  %vm787_vm2 = vcmask 64512   ;;  %vm848_vm3 = vcmask 261120   ;;  %v1362_v63 = vld [vmem:[%s1737_s7 + $0x8] sm:$0xff]  }
  0x47   :  { %v793_v19 = vsel %vm791_vm0, %v781_v18, 0  ;;  %1264 = vmatpush3.bf16.msra.mxu1 %v1358_v16  ;;  %v1359_v20 = vld [vmem:[%s1731_s1] sm:$0xff]   ;;  %1259 = vmatprep.mubr.msk.bf16.mxu0 %vm1388_vm1, %v1387_v17  ;;  %v1389_v12 = vmov 0.0|0.0   ;;  %vm1288_vm4 = vmpackc.low %vm848_vm3, %vm848_vm3  ;;  %s1390_s22 = smov [#allocation3]   ;;  %vm1056_vm5 = vcmask 122880  }
  0x48   :  { %1258 = vmatpush3.bf16.msra.mxu0 %v793_v19  ;;  %1265 = vmatprep.subr.bf16.mxu1 %v1387_v17  ;;  %v1072_v24 = vld [vmem:[%s1733_s3] ss:$0 sm:$0xff]  ;;  %s1064_s23 = sshll.u32 %s1390_s22, 4  ;;  %s1065_s23 = int_to_ptr.vmem [resolvable:$true] %s1064_s23 }
  0x49   :  { %1271 = vmatprep.subr.bf16.mxu0 %v1387_v17  ;;  %1267 = vmatprep.mubr.msk.bf16.mxu1 %vm1388_vm1, %v1387_v17  ;;  %v1361_v62 = vld [vmem:[%s1737_s7] sm:$0xff]   ;;  %s1363_s24 = scalar_lea.vmem %s1065_s23, 16  ;;  %s1367_s25 = scalar_lea.vmem %s1065_s23, 32 }
  0x4a   :  { %v1150_v1 = vld [vmem:[%s1736_s6] ss:$0 sm:$0xff]  ;;  %p1364_p0 = scmp.ne.s32.totalorder %s1065_s23, %s1363_s24  ;;  %p1368_p1 = scmp.lt.s32.totalorder %s1065_s23, %s1065_s23 }
  0x4b   :  { %1260 = vmatmul.mubr.msk.bf16.vlgmr.msra.gmra.mrb[8].mxu0 %vm787_vm2, %v1359_v20  ;;  %1266 = vmatpush3.bf16.msra.mxu1 %v1360_v21  ;;  %v1151_v13 = vld [vmem:[%s1738_s8] ss:$0 sm:$0xff]  ;;  %p1369_p2 = scmp.lt.s32.totalorder %s1367_s25, %s1363_s24 }
  0x4c   :  { %1275 = vmatprep.mubr.msk.bf16.mxu0 %vm1388_vm1, %v1387_v17  ;;  %1272 = vmatpush3.bf16.msra.mxu0 %v1361_v62 }
  0x4d   :  { %1273 = vmatprep.subr.bf16.mxu0 %v1387_v17  ;;  %1286 = vmatprep.subr.bf16.mxu1 %v1389_v12  ;;  %p1370_p3 = por %p1369_p2, %p1368_p1 }
  0x4f   :  { %p1371_p4 = pnand %p1370_p3, %p1364_p0 }
  0x50   :  { %1274 = vmatpush3.bf16.msra.mxu0 %v1362_v63 }
  0xf6   :  { %v1174_v22 = vpop.f32.mrb[0].mxu0 }
  0xf7   :  { %v1196_v23 = vpop.f32.mrb[0].mxu1  ;;  %v1175_v25 = vpop.f32.mrb[1].mxu0 }
  0xf8   :  { %v1176_v26 = vadd.f32 %v1175_v25, %v1174_v22  ;;  %v1197_v27 = vpop.f32.mrb[1].mxu1  ;;  %v1177_v28 = vpop.f32.mrb[2].mxu0 }
  0xf9   :  { %v1198_v29 = vadd.f32 %v1197_v27, %v1196_v23  ;;  %v1199_v30 = vpop.f32.mrb[2].mxu1  ;;  %v1178_v31 = vpop.f32.mrb[3].mxu0  ;;  %v974_v23 = vld [vmem:[%s1739_s9] sm:$0x1] }
  0xfa   :  { %v643_v32 = vadd.f32 %v1176_v26, %v1072_v24  ;;  %v1179_v33 = vadd.f32 %v1178_v31, %v1177_v28  ;;  %v1200_v34 = vpop.f32.mrb[3].mxu1 }
  0xfb   :  { %v1201_v35 = vadd.f32 %v1200_v34, %v1199_v30 }
  0xfc   :  { %v684_v36 = vadd.f32 %v1198_v29, %v643_v32  ;;  %v646_v37 = vadd.f32 %v1179_v33, %v1072_v24  ;;  %v976_v24 = vstv %s1740_s10 }
  0xfe   :  { %v687_v38 = vadd.f32 %v1201_v35, %v646_v37 }
 0x116   :  { %v1218_v39 = vpop.f32.mrb[4].mxu0 }
 0x117   :  { %v1240_v40 = vpop.f32.mrb[4].mxu1  ;;  %v1219_v41 = vpop.f32.mrb[5].mxu0 }
 0x118   :  { %v1220_v42 = vadd.f32 %v1219_v41, %v1218_v39  ;;  %v1241_v43 = vpop.f32.mrb[5].mxu1  ;;  %v1221_v44 = vpop.f32.mrb[6].mxu0 }
 0x119   :  { %v1242_v45 = vadd.f32 %v1241_v43, %v1240_v40  ;;  %v1243_v46 = vpop.f32.mrb[6].mxu1  ;;  %v1222_v47 = vpop.f32.mrb[7].mxu0 }
 0x11a   :  { %v725_v48 = vadd.f32 %v1220_v42, %v684_v36  ;;  %v1223_v49 = vadd.f32 %v1222_v47, %v1221_v44  ;;  %v1244_v50 = vpop.f32.mrb[7].mxu1 }
 0x11b   :  { %v1245_v51 = vadd.f32 %v1244_v50, %v1243_v46 }
 0x11c   :  { %v766_v52 = vadd.f32 %v1242_v45, %v725_v48  ;;  %v728_v53 = vadd.f32 %v1223_v49, %v687_v38 }
 0x11e   :  { %v769_v54 = vadd.f32 %v1245_v51, %v728_v53  ;;  %v772_v55 = vmax.f32 %v766_v52, 0.0  ;;  %v829_v58 = vpop.f32.mrb[8].mxu0 }
 0x11f   :  { %v1261_v59 = vpop.f32.mrb[9].mxu0 }
 0x120   :  { %v773_v56 = vmax.f32 %v769_v54, 0.0  ;;  %v832_v60 = vpop.f32.mrb[10].mxu0 }
 0x121   :  { %v1262_v61 = vpop.f32.mrb[11].mxu0 }
 0x122   :  { %v776_v57 = vpack.c.bf16 %v773_v56, %v772_v55 }
 0x124   :  { %1268 = vmatmul.mubr.msk.bf16.vlgmr.msra.gmra.mrb[8].mxu1 %vm848_vm3, %v776_v57 }
 0x125   :  { %1283 = vmatprep.mubr.msk.f32.mxu1 %vm1388_vm1, %v1387_v17 }
 0x1f7   :  { %v886_v0 = vpop.f32.mrb[8].mxu1 }
 0x1f8   :  { %v887_v2 = vadd.f32 %v886_v0, %v829_v58  ;;  %v1269_v3 = vpop.f32.mrb[9].mxu1 }
 0x1f9   :  { %v889_v4 = vpop.f32.mrb[10].mxu1 }
 0x1fa   :  { %v900_v5 = vadd.f32 %v1150_v1, %v887_v2  ;;  %v890_v6 = vadd.f32 %v889_v4, %v832_v60  ;;  %v1270_v7 = vpop.f32.mrb[11].mxu1 }
 0x1fc   :  { %v901_v8 = vadd.f32 %v1150_v1, %v890_v6  ;;  %v902_v9 = vmax.f32 %v900_v5, 0.0 }
 0x1fe   :  { %v903_v10 = vmax.f32 %v901_v8, 0.0 }
 0x200   :  { %v904_v11 = vpack.c.bf16 %v903_v10, %v902_v9 }
 0x202   :  { %1276 = vmatmul.mubr.msk.bf16.vlgmr.msra.gmra.mrb[12].mxu0 %vm848_vm3, %v904_v11 }
 0x2d5   :  { %v965_v14 = vpop.f32.mrb[12].mxu0 }
 0x2d6   :  { %v966_v15 = vadd.f32 %v1151_v13, %v965_v14  ;;  %v1277_v16 = vpop.f32.mrb[13].mxu0 }
 0x2d7   :  { %v968_v17 = vpop.f32.mrb[14].mxu0 }
 0x2d8   :  { %v969_v18 = vadd.f32 %v1151_v13, %v968_v17  ;;  %v1278_v19 = vpop.f32.mrb[15].mxu0  ;;  %v972_v20 = vmax.f32 %v966_v15, 0.0 }
 0x2da   :  { %v973_v21 = vmax.f32 %v969_v18, 0.0 }
 0x2dc   :  { %v1287_v22 = vpack.c.bf16 %v973_v21, %v972_v20 }
 0x2de   :  { %1289 = vmatpush3.bf16.xpose.msk.msra.mxu1 %vm1288_vm4, %v1287_v22 }
 0x2e5   :  { %1284 = vmatmul.mubr.msk.f32.vlgmr.msra.gmra.mrb[12].mxu1 %vm848_vm3, %v974_v23 }
 0x3b8   :  { %v1052_v25 = vpop.f32.mrb[12].mxu1 }
 0x3b9   :  { %v1053_v26 = vadd.f32 %v1052_v25, %v976_v24  ;;  %v1285_v27 = vpop.f32.mrb[13].mxu1 }
 0x3bb   :  { %1057 = vst.msk [vmem:[#allocation3] sm:$0x1] %vm1056_vm5, %v1053_v26 }
 0x3bc   :  { %1374 = shalt.err (!%p1371_p4)
}
 0x3bd   :  { %s1375_s10 = scalar_lea.hbm %s1741_s11, 16 }
 0x3be   :  { %p1376_p5 = scmp.ne.s32.totalorder %s1741_s11, %s1375_s10  ;;  %p1379_p6 = scmp.lt.u32.totalorder %s1375_s10, %s1741_s11 }
 0x3c0   :  { %p1381_p7 = pnand %p1379_p6, %p1376_p5 }
 0x3c2   :  { %1384 = shalt.err (!%p1381_p7)
}
 0x3c3   :  { %1067 = dma.vmem_to_hbm [thread:$0]  %s1065_s23, 16, %s1741_s11, [#allocation4]  }
 0x3c4   :  { %1385 = dma.done.wait [#allocation4], 16  }
 0x3c5   :  { %1386 = vsyncadd [#allocation4], 4294967280 }
 0x3c6   :  { %1071 = vsyncpa [#allocation4], 1 }

</bundles_post_ra>
